<compile_context>
chip_gen: v6e
topology: v6e:2x2x1
jax: 0.10.0
libtpu: 0.0.40
codegen_flags: <defaults>
</compile_context>

<pallas_src>
import functools

import jax
import jax.numpy as jnp
from jax import lax
from jax.experimental import pallas as pl
from jax.experimental.pallas import tpu as pltpu


_VMEM_LIMIT = 64 * 1024 * 1024   # raised from 32 MiB; per-kernel budgets stay <= ~32 MiB
_NEG_INF = -1e30


def _round_up(x, m):
    return ((x + m - 1) // m) * m


def _pick_tile(dim, target, align, min_blocks=1):
    """Largest tile <= min(dim, target) that divides dim and is `align`-aligned.

    With min_blocks>1, also try to keep at least that many blocks (v7x has 2 cores).
    Falls back to the full dim (always a legal block) if nothing divides.
    """
    if min_blocks > 1:
        target = min(target, max(align, dim // min_blocks))
    if dim <= target:
        return dim
    t = (min(target, dim) // align) * align
    while t >= align:
        if dim % t == 0:
            return t
        t -= align
    return dim


# ----------------------------------------------------------------------------
# Tiled dense matmul kernels (f32 accumulator in VMEM, bf16 MXU operands)
# ----------------------------------------------------------------------------
def _mm_kernel(x_ref, w_ref, o_ref, acc_ref):
    @pl.when(pl.program_id(2) == 0)
    def _():
        acc_ref[...] = jnp.zeros_like(acc_ref)

    acc_ref[...] += jnp.dot(x_ref[...], w_ref[...], preferred_element_type=jnp.float32)

    @pl.when(pl.program_id(2) == pl.num_programs(2) - 1)
    def _():
        o_ref[...] = acc_ref[...].astype(o_ref.dtype)


def _mm_bias_kernel(x_ref, w_ref, b_ref, o_ref, acc_ref):
    @pl.when(pl.program_id(2) == 0)
    def _():
        acc_ref[...] = jnp.zeros_like(acc_ref)

    acc_ref[...] += jnp.dot(x_ref[...], w_ref[...], preferred_element_type=jnp.float32)

    @pl.when(pl.program_id(2) == pl.num_programs(2) - 1)
    def _():
        o_ref[...] = (acc_ref[...] + b_ref[...]).astype(o_ref.dtype)


def _mm_resid_kernel(x_ref, w_ref, r_ref, o_ref, acc_ref):
    @pl.when(pl.program_id(2) == 0)
    def _():
        acc_ref[...] = jnp.zeros_like(acc_ref)

    acc_ref[...] += jnp.dot(x_ref[...], w_ref[...], preferred_element_type=jnp.float32)

    @pl.when(pl.program_id(2) == pl.num_programs(2) - 1)
    def _():
        o_ref[...] = (acc_ref[...] + r_ref[...].astype(jnp.float32)).astype(o_ref.dtype)


def _mm_bias_resid_kernel(x_ref, w_ref, b_ref, r_ref, o_ref, acc_ref):
    @pl.when(pl.program_id(2) == 0)
    def _():
        acc_ref[...] = jnp.zeros_like(acc_ref)

    acc_ref[...] += jnp.dot(x_ref[...], w_ref[...], preferred_element_type=jnp.float32)

    @pl.when(pl.program_id(2) == pl.num_programs(2) - 1)
    def _():
        o_ref[...] = (acc_ref[...] + b_ref[...]
                      + r_ref[...].astype(jnp.float32)).astype(o_ref.dtype)


def matmul(x, w, *, bias=None, residual=None, out_dtype=jnp.bfloat16,
           tm_target=512, tn_target=512, tk_target=1024):
    """x: [M, K], w: [K, N] -> [M, N].  Optional fused bias [N] and residual [M, N]."""
    M, K = x.shape
    _, N = w.shape
    tm = _pick_tile(M, tm_target, 8)
    tn = _pick_tile(N, tn_target, 128)
    tk = _pick_tile(K, tk_target, 128)
    grid = (M // tm, N // tn, K // tk)

    in_specs = [
        pl.BlockSpec((tm, tk), lambda i, j, k: (i, k)),
        pl.BlockSpec((tk, tn), lambda i, j, k: (k, j)),
    ]
    operands = [x, w]
    if bias is not None:
        in_specs.append(pl.BlockSpec((1, tn), lambda i, j, k: (0, j)))
        operands.append(bias.reshape(1, N).astype(jnp.float32))
    if residual is not None:
        in_specs.append(pl.BlockSpec((tm, tn), lambda i, j, k: (i, j)))
        operands.append(residual)

    if bias is not None and residual is not None:
        kernel = _mm_bias_resid_kernel
    elif bias is not None:
        kernel = _mm_bias_kernel
    elif residual is not None:
        kernel = _mm_resid_kernel
    else:
        kernel = _mm_kernel

    return pl.pallas_call(
        kernel,
        out_shape=jax.ShapeDtypeStruct((M, N), out_dtype),
        grid=grid,
        in_specs=in_specs,
        out_specs=pl.BlockSpec((tm, tn), lambda i, j, k: (i, j)),
        scratch_shapes=[pltpu.VMEM((tm, tn), jnp.float32)],
        compiler_params=pltpu.CompilerParams(
            dimension_semantics=("parallel", "parallel", "arbitrary"),
            vmem_limit_bytes=_VMEM_LIMIT),
    )(*operands)


# ----------------------------------------------------------------------------
# Token-tiled LayerNorm (f32 math, bf16 in/out)
# ----------------------------------------------------------------------------
def _layernorm_kernel(x_ref, g_ref, b_ref, o_ref, *, eps):
    x = x_ref[...].astype(jnp.float32)
    mean = jnp.mean(x, axis=-1, keepdims=True)
    var = jnp.mean(jnp.square(x - mean), axis=-1, keepdims=True)
    y = (x - mean) * lax.rsqrt(var + eps)
    o_ref[...] = (y * g_ref[...].astype(jnp.float32)
                  + b_ref[...].astype(jnp.float32)).astype(o_ref.dtype)


def layer_norm(x, gamma, beta, eps, tt_target=512):
    T, H = x.shape
    # keep at least 2 token blocks where possible so both v7x TensorCores have work
    tt = _pick_tile(T, tt_target, 8, min_blocks=2)
    return pl.pallas_call(
        functools.partial(_layernorm_kernel, eps=eps),
        out_shape=jax.ShapeDtypeStruct((T, H), x.dtype),
        grid=(T // tt,),
        in_specs=[
            pl.BlockSpec((tt, H), lambda i: (i, 0)),
            pl.BlockSpec((1, H), lambda i: (0, 0)),
            pl.BlockSpec((1, H), lambda i: (0, 0)),
        ],
        out_specs=pl.BlockSpec((tt, H), lambda i: (i, 0)),
        compiler_params=pltpu.CompilerParams(
            dimension_semantics=("parallel",),
            vmem_limit_bytes=_VMEM_LIMIT),
    )(x, gamma.reshape(1, H), beta.reshape(1, H))


# ----------------------------------------------------------------------------
# Flash-style causal attention, token-major in/out, GQA via column BlockSpecs
# ----------------------------------------------------------------------------
def _flash_kernel(q_ref, k_ref, v_ref, o_ref, m_ref, l_ref, acc_ref,
                  *, tq, tkv, rep, D):
    qi = pl.program_id(1)
    ki = pl.program_id(2)

    @pl.when(ki == 0)
    def _():
        m_ref[...] = jnp.full_like(m_ref, _NEG_INF)
        l_ref[...] = jnp.zeros_like(l_ref)
        acc_ref[...] = jnp.zeros_like(acc_ref)

    q_start = qi * tq
    kv_start = ki * tkv

    # skip kv tiles fully above the causal diagonal (K/V index_map is clamped, so
    # skipped tiles also re-use the already-resident block -> no extra DMA either)
    @pl.when(kv_start <= q_start + tq - 1)
    def _():
        k = k_ref[...]                                           # [tkv, D] bf16
        v = v_ref[...]
        row = q_start + lax.broadcasted_iota(jnp.int32, (tq, tkv), 0)
        col = kv_start + lax.broadcasted_iota(jnp.int32, (tq, tkv), 1)
        causal = col <= row
        # TODO(synk): flattened T is treated as one sequence; batched prefill needs
        #             per-sequence segment ids / paged KV cache from ForwardBatch.
        for r in range(rep):                                     # q heads sharing this kv head
            q = q_ref[:, r * D:(r + 1) * D]                      # [tq, D] (already scaled)
            s = lax.dot_general(q, k, (((1,), (1,)), ((), ())),
                                preferred_element_type=jnp.float32)   # [tq, tkv]
            s = jnp.where(causal, s, _NEG_INF)
            m_prev = m_ref[r]                                    # [tq, 1]
            m_new = jnp.maximum(m_prev, jnp.max(s, axis=-1, keepdims=True))
            alpha = jnp.exp(m_prev - m_new)
            p = jnp.exp(s - m_new)
            l_ref[r] = alpha * l_ref[r] + jnp.sum(p, axis=-1, keepdims=True)
            acc_ref[r] = alpha * acc_ref[r] + jnp.dot(
                p.astype(v.dtype), v, preferred_element_type=jnp.float32)
            m_ref[r] = m_new

    @pl.when(ki == pl.num_programs(2) - 1)
    def _():
        for r in range(rep):
            inv = pl.reciprocal(l_ref[r], approx=True)
            o_ref[:, r * D:(r + 1) * D] = (acc_ref[r] * inv).astype(o_ref.dtype)


def flash_attention(q, k, v, *, num_kv_heads, head_dim, tq_target=256, tkv_target=256):
    """q: [T, nH*D] (pre-scaled), k/v: [T, nKV*D] -> [T, nH*D], all token-major bf16."""
    T, QH = q.shape
    nKV, D = num_kv_heads, head_dim
    rep = QH // (nKV * D)
    assert QH == nKV * rep * D and k.shape == (T, nKV * D) and v.shape == k.shape
    assert D % 128 == 0, "head_dim must be a multiple of 128 for lane-aligned K/V blocks"
    tq = _pick_tile(T, tq_target, 8)
    tkv = _pick_tile(T, tkv_target, 128)
    grid = (nKV, T // tq, T // tkv)

    # clamp K/V block index to the last causally needed block -> masked tiles do not DMA
    def kv_idx(g, qi, ki):
        return (jnp.minimum(ki, ((qi + 1) * tq - 1) // tkv), g)

    kernel = functools.partial(_flash_kernel, tq=tq, tkv=tkv, rep=rep, D=D)
    return pl.pallas_call(
        kernel,
        out_shape=jax.ShapeDtypeStruct((T, QH), q.dtype),
        grid=grid,
        in_specs=[
            pl.BlockSpec((tq, rep * D), lambda g, qi, ki: (qi, g)),
            pl.BlockSpec((tkv, D), kv_idx),
            pl.BlockSpec((tkv, D), kv_idx),
        ],
        out_specs=pl.BlockSpec((tq, rep * D), lambda g, qi, ki: (qi, g)),
        scratch_shapes=[
            pltpu.VMEM((rep, tq, 1), jnp.float32),   # running max
            pltpu.VMEM((rep, tq, 1), jnp.float32),   # running denom
            pltpu.VMEM((rep, tq, D), jnp.float32),   # running output
        ],
        compiler_params=pltpu.CompilerParams(
            dimension_semantics=("parallel", "parallel", "arbitrary"),
            vmem_limit_bytes=_VMEM_LIMIT),
    )(q, k, v)


# ----------------------------------------------------------------------------
# Token-grouped (group-GEMM) fused MoE experts
#   tokens are sorted/padded per expert in JAX; the kernel only multiplies each
#   expert's weights by the tokens actually routed to it (scalar-prefetched
#   per-block expert id drives the weight index_map).
# ----------------------------------------------------------------------------
def _moe_group_kernel(be_ref, x_ref, w1_ref, w3_ref, w2_ref, gw_ref, o_ref, acc_ref):
    del be_ref  # only used by the index_maps
    l = pl.program_id(1)

    @pl.when(l == 0)
    def _():
        acc_ref[...] = jnp.zeros_like(acc_ref)

    gw = gw_ref[...]                                   # [tt, 1] f32 routing weights

    # pad blocks (all-zero weights) skip the three GEMMs entirely
    @pl.when(jnp.sum(gw) > 0.0)
    def _():
        x = x_ref[...]                                 # [tt, H] bf16
        g = jnp.dot(x, w1_ref[...], preferred_element_type=jnp.float32)   # gate proj slab
        u = jnp.dot(x, w3_ref[...], preferred_element_type=jnp.float32)   # up proj slab
        h = ((g * lax.logistic(g)) * u).astype(x.dtype)                   # silu(g)*u, bf16
        acc_ref[...] += jnp.dot(h, w2_ref[...], preferred_element_type=jnp.float32)

    @pl.when(l == pl.num_programs(1) - 1)
    def _():
        o_ref[...] = (acc_ref[...] * gw).astype(o_ref.dtype)


def moe_experts_grouped(x, w1, w3, w2, topk_w, topk_ids, *, tt_target=128, ti_target=512):
    """x: [T, H]; w1/w3: [E, H, I]; w2: [E, I, H]; topk_w/topk_ids: [T, K] -> [T, H] f32."""
    T, H = x.shape
    E, _, I = w1.shape
    K = topk_ids.shape[1]
    A = T * K
    tt = max(8, min(tt_target, _round_up(A, 8)))
    ti = _pick_tile(I, ti_target, 128)
    num_blocks = -(-A // tt) + E                       # static upper bound on expert blocks
    P = num_blocks * tt

    # ---- routing prep (tiny [A]-sized JAX ops) -------------------------------
    flat_e = topk_ids.reshape(A).astype(jnp.int32)
    flat_w = topk_w.reshape(A).astype(jnp.float32)
    flat_t = jnp.arange(A, dtype=jnp.int32) // K       # token id of each assignment
    order = jnp.argsort(flat_e)
    sorted_e = flat_e[order]
    sorted_t = flat_t[order]
    sorted_w = flat_w[order]
    counts = jnp.bincount(flat_e, length=E).astype(jnp.int32)
    csum_c = jnp.cumsum(counts)
    start_c = csum_c - counts
    blocks_per_e = (counts + tt - 1) // tt
    csum_b = jnp.cumsum(blocks_per_e)
    start_b = csum_b - blocks_per_e
    rank = jnp.arange(A, dtype=jnp.int32) - start_c[sorted_e]
    dest = start_b[sorted_e] * tt + rank               # slot of each assignment in padded layout
    token_idx = jnp.full((P,), T, dtype=jnp.int32).at[dest].set(sorted_t)
    gate_w = jnp.zeros((P,), jnp.float32).at[dest].set(sorted_w)
    total_blocks = csum_b[-1]
    bids = jnp.arange(num_blocks, dtype=jnp.int32)
    # pad blocks repeat the last real block's expert -> no extra weight DMA for them
    block_expert = jnp.searchsorted(
        csum_b, jnp.minimum(bids, total_blocks - 1), side="right").astype(jnp.int32)

    x_pad = jnp.concatenate([x, jnp.zeros((1, H), x.dtype)], axis=0)     # row T = zeros
    x_sorted = x_pad[token_idx]                                          # [P, H] row gather

    # ---- group GEMM kernel ---------------------------------------------------
    out = pl.pallas_call(
        _moe_group_kernel,
        out_shape=jax.ShapeDtypeStruct((P, H), x.dtype),
        grid_spec=pltpu.PrefetchScalarGridSpec(
            num_scalar_prefetch=1,
            grid=(num_blocks, I // ti),
            in_specs=[
                pl.BlockSpec((tt, H), lambda b, l, be: (b, 0)),
                pl.BlockSpec((None, H, ti), lambda b, l, be: (be[b], 0, l)),
                pl.BlockSpec((None, H, ti), lambda b, l, be: (be[b], 0, l)),
                pl.BlockSpec((None, ti, H), lambda b, l, be: (be[b], l, 0)),
                pl.BlockSpec((tt, 1), lambda b, l, be: (b, 0)),
            ],
            out_specs=pl.BlockSpec((tt, H), lambda b, l, be: (b, 0)),
            scratch_shapes=[pltpu.VMEM((tt, H), jnp.float32)],
        ),
        compiler_params=pltpu.CompilerParams(
            dimension_semantics=("parallel", "arbitrary"),
            vmem_limit_bytes=_VMEM_LIMIT),
    )(block_expert, x_sorted, w1, w3, w2, gate_w.reshape(P, 1))

    # ---- unpermute via gather (TPU-friendly, no big scatter) ------------------
    dest_by_assign = jnp.zeros((A,), jnp.int32).at[order].set(dest)
    contrib = out[dest_by_assign].astype(jnp.float32).reshape(T, K, H)
    return jnp.sum(contrib, axis=1)                                       # [T, H] f32


# ----------------------------------------------------------------------------
# Routing (sparsemixer) — tiny [T, E] math, kept in plain JAX (E << 128)
# ----------------------------------------------------------------------------
def sparsemixer(scores, jitter_eps=0.01):
    E = scores.shape[-1]
    max_val = jnp.max(scores, axis=-1, keepdims=True)
    max_ind = jnp.argmax(scores, axis=-1, keepdims=True)
    factor = jnp.maximum(jnp.abs(scores), max_val)                 # clamp(min=max)
    mask = ((max_val - scores) / factor) > (2.0 * jitter_eps)
    masked_gates = jax.nn.softmax(jnp.where(mask, -jnp.inf, scores), axis=-1)
    mult1 = jnp.take_along_axis(masked_gates, max_ind, axis=-1)

    masked_scores = jnp.where(jnp.arange(E)[None, :] == max_ind, -jnp.inf, scores)
    max_val2 = jnp.max(masked_scores, axis=-1, keepdims=True)
    max_ind2 = jnp.argmax(masked_scores, axis=-1, keepdims=True)
    factor2 = jnp.maximum(jnp.abs(scores), max_val2)
    mask2 = ((max_val2 - scores) / factor2) > (2.0 * jitter_eps)
    masked_gates2 = jax.nn.softmax(jnp.where(mask2, -jnp.inf, masked_scores), axis=-1)
    mult2 = jnp.take_along_axis(masked_gates2, max_ind2, axis=-1)

    weights = jnp.concatenate([mult1, mult2], axis=-1)             # [T, 2]
    ids = jnp.concatenate([max_ind, max_ind2], axis=-1).astype(jnp.int32)
    return weights, ids


def phimoe_routing(gating_output, topk=2, renormalize=False):
    assert topk == 2 and renormalize is False
    return sparsemixer(gating_output)


# ----------------------------------------------------------------------------
# Model glue (RoPE, layers, full forward)
# ----------------------------------------------------------------------------
def rope_tables(positions, head_dim, theta):
    """cos/sin tables computed once per forward.  TODO(synk): longrope (su-scaled)."""
    half = head_dim // 2
    inv_freq = 1.0 / (theta ** (jnp.arange(0, half, dtype=jnp.float32) / half))
    freqs = positions[:, None].astype(jnp.float32) * inv_freq[None, :]   # [T, half]
    return jnp.cos(freqs), jnp.sin(freqs)


def apply_rope(x, cos, sin):
    """Neox-style RoPE. x: [T, n, D] -> f32."""
    half = x.shape[-1] // 2
    xf = x.astype(jnp.float32)
    x1, x2 = xf[..., :half], xf[..., half:]
    c = cos[:, None, :]
    s = sin[:, None, :]
    return jnp.concatenate([x1 * c - x2 * s, x2 * c + x1 * s], axis=-1)


def decoder_layer(hidden, cos, sin, p, cfg):
    T, H = hidden.shape
    nH, nKV, D = cfg["num_heads"], cfg["num_kv_heads"], cfg["head_dim"]
    eps = cfg["rms_norm_eps"]
    scale = float(D) ** -0.5

    # --- self attention block ---
    residual = hidden
    x = layer_norm(hidden, p["ln1_g"], p["ln1_b"], eps)                  # bf16 [T, H]
    qkv = matmul(x, p["w_qkv"], bias=p.get("b_qkv"))                     # bf16 [T, (nH+2nKV)D]
    q = qkv[:, : nH * D]
    k = qkv[:, nH * D:(nH + nKV) * D]
    v = qkv[:, (nH + nKV) * D:]
    # softmax scale folded into the q RoPE pass; everything stays token-major
    q = (apply_rope(q.reshape(T, nH, D), cos, sin) * scale
         ).astype(jnp.bfloat16).reshape(T, nH * D)
    k = apply_rope(k.reshape(T, nKV, D), cos, sin).astype(jnp.bfloat16).reshape(T, nKV * D)
    attn = flash_attention(q, k, v, num_kv_heads=nKV, head_dim=D)        # [T, nH*D]
    hidden = matmul(attn, p["w_o"], bias=p.get("b_o"), residual=residual)  # o_proj(+bias)+resid

    # --- MoE block ---
    residual = hidden
    x = layer_norm(hidden, p["ln2_g"], p["ln2_b"], eps)
    # router gate: bf16 MXU matmul with f32 accumulation (E << 128, tiny output)
    router_logits = jnp.dot(x, p["w_gate"], preferred_element_type=jnp.float32)
    topk_w, topk_ids = phimoe_routing(router_logits, topk=2, renormalize=False)
    moe_out = moe_experts_grouped(x, p["w1"], p["w3"], p["w2"], topk_w, topk_ids)
    hidden = (residual.astype(jnp.float32) + moe_out).astype(jnp.bfloat16)
    return hidden


def phimoe_forward(input_ids, positions, params, cfg):
    hidden = jnp.take(params["embed"], input_ids, axis=0)               # bf16 [T, H]
    cos, sin = rope_tables(positions, cfg["head_dim"], cfg["rope_theta"])
    for lp in params["layers"]:
        hidden = decoder_layer(hidden, cos, sin, lp, cfg)
    hidden = layer_norm(hidden, params["norm_g"], params["norm_b"], cfg["rms_norm_eps"])
    # lm_head only for the sampled (last) position, matching sglang LogitsProcessor.
    # TODO(synk): batched prefill needs a per-sequence last-token gather (ForwardBatch).
    last = hidden[-1:]
    next_logits = matmul(last, params["lm_head_w"], bias=params["lm_head_b"],
                         out_dtype=jnp.float32)[0]                      # [V]
    return hidden, next_logits


# ----------------------------------------------------------------------------
# Deterministic synthetic parameter init (bf16 weights, f32 norms/biases)
# ----------------------------------------------------------------------------
def init_params(key, cfg):
    H, I, E = cfg["hidden_size"], cfg["intermediate_size"], cfg["num_experts"]
    nH, nKV, D = cfg["num_heads"], cfg["num_kv_heads"], cfg["head_dim"]
    V = cfg["vocab_size"]
    std = 0.02

    def nrm(k, shape, dtype=jnp.bfloat16):
        return (std * jax.random.normal(k, shape, jnp.float32)).astype(dtype)

    keys = jax.random.split(key, 4 + cfg["num_layers"])
    params = {
        "embed": nrm(keys[0], (V, H)),
        "norm_g": jnp.ones((H,), jnp.float32),
        "norm_b": jnp.zeros((H,), jnp.float32),
        "lm_head_w": nrm(keys[1], (H, V)),
        "lm_head_b": nrm(keys[2], (V,), jnp.float32),
        "layers": [],
    }
    for li in range(cfg["num_layers"]):
        lk = jax.random.split(keys[4 + li], 10)
        layer = {
            "ln1_g": jnp.ones((H,), jnp.float32),
            "ln1_b": jnp.zeros((H,), jnp.float32),
            "ln2_g": jnp.ones((H,), jnp.float32),
            "ln2_b": jnp.zeros((H,), jnp.float32),
            "w_qkv": nrm(lk[0], (H, (nH + 2 * nKV) * D)),
            "w_o": nrm(lk[1], (nH * D, H)),
            "w_gate": nrm(lk[2], (H, E)),
            "w1": nrm(lk[3], (E, H, I)),
            "w3": nrm(lk[4], (E, H, I)),
            "w2": nrm(lk[5], (E, I, H)),
        }
        if cfg.get("attention_bias", False):
            layer["b_qkv"] = nrm(lk[6], ((nH + 2 * nKV) * D,), jnp.float32)
            layer["b_o"] = nrm(lk[7], (H,), jnp.float32)
        params["layers"].append(layer)
    return params


if __name__ == "__main__":
    cfg = dict(
        vocab_size=512,
        hidden_size=256,
        intermediate_size=512,
        num_layers=2,
        num_heads=4,
        num_kv_heads=2,
        head_dim=128,
        num_experts=8,
        rope_theta=1e6,
        rms_norm_eps=1e-5,
        attention_bias=True,
    )
    key = jax.random.PRNGKey(0)
    pkey, ikey = jax.random.split(key)
    params = init_params(pkey, cfg)

    T = 128  # flattened tokens (batch * seq, as in sglang extend)
    input_ids = jax.random.randint(ikey, (T,), 0, cfg["vocab_size"], dtype=jnp.int32)
    positions = jnp.arange(T, dtype=jnp.int32)

    hidden, next_logits = phimoe_forward(input_ids, positions, params, cfg)
    jax.block_until_ready((hidden, next_logits))
    assert hidden.shape == (T, cfg["hidden_size"])
    assert next_logits.shape == (cfg["vocab_size"],)
    assert bool(jnp.all(jnp.isfinite(next_logits)))
    assert bool(jnp.all(jnp.isfinite(hidden.astype(jnp.float32))))
    print("KERNEL_OK")
</pallas_src>

<mosaic_0001>
module attributes {stable_mosaic.version = 11 : i64} {
  func.func @_layernorm_kernel(%arg0: i32, %arg1: memref<64x256xbf16, #tpu.memory_space<vmem>>, %arg2: memref<1x256xf32, #tpu.memory_space<vmem>>, %arg3: memref<1x256xf32, #tpu.memory_space<vmem>>, %arg4: memref<64x256xbf16, #tpu.memory_space<vmem>>) attributes {dimension_semantics = [#tpu.dimension_semantics<parallel>], iteration_bounds = array<i64: 2>, scalar_prefetch = 0 : i64, scratch_operands = 0 : i64, tpu.core_type = #tpu.core_type<tc>, window_params = [{transform_indices = @transform_0, window_bounds = array<i64: 64, 256>}, {pipeline_mode = #tpu.pipeline_mode<synchronous>, transform_indices = @transform_1, window_bounds = array<i64: 1, 256>}, {pipeline_mode = #tpu.pipeline_mode<synchronous>, transform_indices = @transform_2, window_bounds = array<i64: 1, 256>}, {transform_indices = @transform_3, window_bounds = array<i64: 64, 256>}]} {
    %c0 = arith.constant 0 : index
    %c0_0 = arith.constant 0 : index
    %0 = vector.load %arg1[%c0, %c0_0] : memref<64x256xbf16, #tpu.memory_space<vmem>>, vector<64x256xbf16>
    %1 = arith.extf %0 : vector<64x256xbf16> to vector<64x256xf32>
    %cst = arith.constant dense<0.000000e+00> : vector<64xf32>
    %2 = vector.multi_reduction <add>, %1, %cst [1] : vector<64x256xf32> to vector<64xf32>
    %3 = vector.shape_cast %2 : vector<64xf32> to vector<64x1xf32>
    %cst_1 = arith.constant 2.560000e+02 : f32
    %4 = vector.broadcast %cst_1 : f32 to vector<64x1xf32>
    %5 = arith.divf %3, %4 : vector<64x1xf32>
    %6 = vector.broadcast %5 : vector<64x1xf32> to vector<64x256xf32>
    %7 = arith.subf %1, %6 : vector<64x256xf32>
    %8 = arith.mulf %7, %7 : vector<64x256xf32>
    %cst_2 = arith.constant dense<0.000000e+00> : vector<64xf32>
    %9 = vector.multi_reduction <add>, %8, %cst_2 [1] : vector<64x256xf32> to vector<64xf32>
    %10 = vector.shape_cast %9 : vector<64xf32> to vector<64x1xf32>
    %cst_3 = arith.constant 2.560000e+02 : f32
    %11 = vector.broadcast %cst_3 : f32 to vector<64x1xf32>
    %12 = arith.divf %10, %11 : vector<64x1xf32>
    %13 = vector.broadcast %5 : vector<64x1xf32> to vector<64x256xf32>
    %14 = arith.subf %1, %13 : vector<64x256xf32>
    %cst_4 = arith.constant 9.99999974E-6 : f32
    %15 = vector.broadcast %cst_4 : f32 to vector<64x1xf32>
    %16 = arith.addf %12, %15 : vector<64x1xf32>
    %17 = math.rsqrt %16 : vector<64x1xf32>
    %18 = vector.broadcast %17 : vector<64x1xf32> to vector<64x256xf32>
    %19 = arith.mulf %14, %18 : vector<64x256xf32>
    %c0_5 = arith.constant 0 : index
    %c0_6 = arith.constant 0 : index
    %20 = vector.load %arg2[%c0_5, %c0_6] : memref<1x256xf32, #tpu.memory_space<vmem>>, vector<1x256xf32>
    %21 = vector.broadcast %20 : vector<1x256xf32> to vector<64x256xf32>
    %22 = arith.mulf %19, %21 : vector<64x256xf32>
    %c0_7 = arith.constant 0 : index
    %c0_8 = arith.constant 0 : index
    %23 = vector.load %arg3[%c0_7, %c0_8] : memref<1x256xf32, #tpu.memory_space<vmem>>, vector<1x256xf32>
    %24 = vector.broadcast %23 : vector<1x256xf32> to vector<64x256xf32>
    %25 = arith.addf %22, %24 : vector<64x256xf32>
    %26 = arith.truncf %25 : vector<64x256xf32> to vector<64x256xbf16>
    %c0_9 = arith.constant 0 : index
    %c0_10 = arith.constant 0 : index
    %27 = vector.load %arg4[%c0_9, %c0_10] : memref<64x256xbf16, #tpu.memory_space<vmem>>, vector<64x256xbf16>
    tpu.vector_store %arg4[%c0_9, %c0_10], %26 {strides = array<i32>} : memref<64x256xbf16, #tpu.memory_space<vmem>>, vector<64x256xbf16>,
    return
  }
  func.func @transform_0(%arg0: i32) -> (i32, i32) {
    %c0_i32 = arith.constant 0 : i32
    %c0_i32_0 = arith.constant 0 : i32
    return %arg0, %c0_i32 : i32, i32
  }
  func.func @transform_1(%arg0: i32) -> (i32, i32) {
    %c0_i32 = arith.constant 0 : i32
    %c0_i32_0 = arith.constant 0 : i32
    %c0_i32_1 = arith.constant 0 : i32
    return %c0_i32, %c0_i32_0 : i32, i32
  }
  func.func @transform_2(%arg0: i32) -> (i32, i32) {
    %c0_i32 = arith.constant 0 : i32
    %c0_i32_0 = arith.constant 0 : i32
    %c0_i32_1 = arith.constant 0 : i32
    return %c0_i32, %c0_i32_0 : i32, i32
  }
  func.func @transform_3(%arg0: i32) -> (i32, i32) {
    %c0_i32 = arith.constant 0 : i32
    %c0_i32_0 = arith.constant 0 : i32
    return %arg0, %c0_i32 : i32, i32
  }
}

</mosaic_0001>

<bundles_post_ra>
// kernel: tpu_custom_call.1
= control target key start
LH: loop header
LB: loop body
LE: loop exit
PB: predicated region body
PF: predicated region fallthrough
CT: control target
= control target key end

     0   :  { %8 = vsyncpa [#allocation3], 0  ;;  %s1165_s0 = inlined_call_operand.hbm [shape: bf16[128,256], index: 0, kind: input, shape index: {}]   ;;  %s1166_s1 = inlined_call_operand.hbm [shape: f32[1,256], index: 1, kind: input, shape index: {}]   ;;  %s1167_s2 = inlined_call_operand.vmem [shape: f32[1,256], index: 2, kind: input, shape index: {}]   ;;  %s1168_s3 = inlined_call_operand.hbm [shape: bf16[128,256], index: 3, kind: output, shape index: {}]  }
   0x1   :  { %10 = vsyncpa [#allocation3 + $0x1], 0 }
   0x2   :  { %11 = vsyncpa [#allocation6], 0 }
   0x3   :  { %12 = vsyncpa [#allocation4], 0 }
   0x4   :  { %14 = vsyncpa [#allocation4 + $0x1], 0  ;;  %s834_s12 = smov 0   ;;  %s836_s13 = smov 0  }
   0x5   :  { %s838_s14 = smov 0   ;;  %s840_s15 = smov 0  }
   0x6 LB: > { %s855_s16 = sadd.s32 4294967295, %s805_s15   ;;  %s568_s17 = sadd.s32 4294967294, %s805_s15   ;;  %s805_s15 = sphi %s840_s15, %s1191_s15   ;;  %s801_s14 = sphi %s838_s14, %s1190_s14   ;;  %s797_s13 = sphi %s836_s13, %s1189_s13   ;;  %s793_s12 = sphi %s834_s12, %s1188_s12  }
   0x7   : > { %s859_s18 = sadd.s32 1, %s805_s15   ;;  %s27_s19 = sadd.s32 1, %s801_s14 }
   0x8   : > { %s24_s20 = ssub.s32 %s805_s15, %s859_s18  ;;  %p34_p0 = scmp.ne.s32.totalorder %s801_s14, %s797_s13 }
   0x9   : > { %p25_p1 = scmp.eq.s32.totalorder %s24_s20, 0  ;;  %p35_p2 = scmp.eq.s32.totalorder %s805_s15, 0 }
   0xa   : > { %p40_p3 = scmp.ne.s32.totalorder %s797_s13, %s793_s12  ;;  %p1169_p4 = scmp.eq.s32.totalorder %s855_s16, 0 }
   0xb   : > { %s871_s21 = scalar_select %p25_p1, %s801_s14, %s27_s19  }
   0xc   : > { %p873_p5 = por %p35_p2, %p34_p0  ;;  %p879_p6 = por %p1169_p4, %p40_p3 }
   0xd   : > { %p106_p7 = scmp.eq.s32.totalorder %s855_s16, 1  ;;  %p112_p8 = scmp.eq.s32.totalorder %s568_s17, 1 }
   0xe   : > { %s1174_s23 = scalar_select %p879_p6, 1, 0 }
   0xf   : > { %p569_p9 = scmp.ge.s32.totalorder %s805_s15, 1  ;;  %p119_p10 = scmp.lt.s32.totalorder %s805_s15, 3 }
  0x10   : > { %p886_p11 = por %p106_p7, %p34_p0  ;;  %p890_p12 = por %p112_p8, %p40_p3 }
  0x11   : > { %p894_p13 = pnand %p569_p9, %p119_p10  ;;  %s807_s27 = smov [#allocation5]  }
  0x12   : > { %s1175_s24 = scalar_select %p886_p11, 1, 0 }
  0x13   : > { %s1176_s25 = scalar_select %p890_p12, 1, 0 }
  0x14   : > { %s1177_s26 = scalar_select %p894_p13, 1, 0 }
  0x15   : > { %p614_p2 = pneg %p894_p13  ;;  %s132_s28 = sshll.u32 %s807_s27, 4  ;;  %s133_s28 = int_to_ptr.vmem [resolvable:$true] %s132_s28 }
  0x16   : > { %p627_p4 = scmp.lt.s32.totalorder %s805_s15, 2  ;;  %p1178_p0 = scmp.eq.s32.totalorder %s855_s16, 0 }
  0x17   : > { %s146_s30 = sand.u32 1, %s801_s14   ;;  %s694_s6 = scalar_lea.vmem %s133_s28, 32 }
  0x18   : > { %p904_p7 = pnand %p614_p2, %p1178_p0  ;;  %p911_p3 = pnand %p627_p4, %p873_p5 }
  0x19   : > { %s572_s5 = sshll.u32 %s146_s30, 6  ;;  %p695_p9 = scmp.ne.s32.totalorder %s133_s28, %s694_s6 }
  0x1a   : > { %p685_p8 = pneg %p904_p7  ;;  %p702_p12 = scmp.lt.s32.totalorder %s133_s28, %s133_s28 }
  0x1b   : > { %p703_p11 = scmp.lt.s32.totalorder %s694_s6, %s694_s6 }
  0x1c   : > { %p697_p10 = pnand %p695_p9, %p685_p8 }
  0x1d   : > { %p704_p2 = por %p703_p11, %p702_p12 }
  0x1e   : > { %p698_p1 = pneg %p697_p10 }
  0x20   : > { %p705_p0 = pnand %p704_p2, %p698_p1 }
  0x22   : > { %708 = shalt.err (!%p705_p0)
}
  0x23   : > { %617 = dma.hbm_to_vmem [thread:$0]  (!%p904_p7), %s1166_s1, 32, %s133_s28, [#allocation6]  }
  0x24   : > { %s595_s9 = sshll.u32 %s805_s15, 10  ;;  %s150_s10 = scalar_lea.vmem [#allocation2], %s572_s5 }
  0x25   : > { %s158_s11 = sshll.u32 %s150_s10, 4  ;;  %s926_s20 = scalar_lea.hbm %s1165_s0, %s595_s9  ;;  %s928_s11 = int_to_ptr.vmem [resolvable:$true] %s158_s11 }
  0x26   : > { %s930_s22 = scalar_lea.sflag [#allocation3], %s146_s30  ;;  %s709_s27 = scalar_lea.hbm %s926_s20, 1024 }
  0x27   : > { %p710_p4 = scmp.ne.s32.totalorder %s926_s20, %s709_s27  ;;  %p711_p5 = pneg %p911_p3 }
  0x28   : > { %s714_s5 = scalar_lea.hbm %s1165_s0, 2048  ;;  %p715_p1 = scmp.lt.s32.totalorder %s926_s20, %s1165_s0 }
  0x29   : > { %p712_p11 = pnand %p711_p5, %p710_p4  ;;  %p716_p7 = scmp.lt.s32.totalorder %s714_s5, %s709_s27 }
  0x2b   : > { %p713_p12 = pneg %p712_p11  ;;  %p717_p8 = por %p716_p7, %p715_p1 }
  0x2d   : > { %p718_p9 = pnand %p717_p8, %p713_p12 }
  0x2f   : > { %721 = shalt.err (!%p718_p9)
}
  0x30   : > { %s722_s30 = scalar_lea.vmem %s928_s11, 1024  ;;  %s808_s8 = smov [#allocation2]  }
  0x31   : > { %p723_p10 = scmp.ne.s32.totalorder %s928_s11, %s722_s30  ;;  %s727_s9 = sshll.u32 %s808_s8, 4  ;;  %s728_s9 = int_to_ptr.vmem [resolvable:$false] %s727_s9 }
  0x32   : > { %s729_s10 = scalar_lea.vmem %s728_s9, 2048  ;;  %p730_p4 = scmp.lt.s32.totalorder %s928_s11, %s728_s9 }
  0x33   : > { %p725_p2 = pnand %p723_p10, %p711_p5  ;;  %p731_p11 = scmp.lt.s32.totalorder %s729_s10, %s722_s30 }
  0x35   : > { %p726_p0 = pneg %p725_p2  ;;  %p732_p6 = por %p731_p11, %p730_p4 }
  0x37   : > { %p733_p13 = pnand %p732_p6, %p726_p0 }
  0x39   : > { %736 = shalt.err (!%p733_p13)
}
  0x3a   : > { %s809_s17 = smov 128   ;;  %s810_s19 = smov 8  }
  0x3b   : > { %621 = dma.hbm_to_vmem [thread:$0]  (!%p911_p3), %s926_s20, 1024, %s928_s11, %s930_s22, %s809_s17, %s809_s17, %s810_s19  }
  0x3c   : > { %p1181_p5 = scmp.ne.s32.totalorder %s1177_s26, 0 }
  0x3d   : > { %s954_s27 = sand.u32 (!%p1181_p5), 1, %s797_s13   ;;  %p1182_p6 = scmp.ne.s32.totalorder (!%p1181_p5), %s1174_s23, 0 }
  0x3e   : > { %170 = sbr.rel (%p1181_p5) target bundleno = 417 (0x1a1), region = 32  ;;  %s577_s28 = sshll.u32 (!%p1181_p5), %s954_s27, 6 }
  0x3f   : > { %s173_s29 = scalar_lea.sflag (!%p1181_p5), [#allocation3], %s954_s27  ;;  %s176_s5 = scalar_lea.vmem (!%p1181_p5), [#allocation2], %s577_s28 }
  0x43   : > { %780 = dma.done.wait (%p1182_p6), %s173_s29, 1024  }
  0x44   : > { %782 = vsyncadd (%p1182_p6), %s173_s29, 4294966272  ;;  %p1183_p13 = scmp.eq.s32.totalorder %s855_s16, 0 }
  0x46   : > { %784 = dma.done.wait (%p1183_p13), [#allocation6], 32   ;;  %p1184_p3 = pmov %p1183_p13 }
  0x47   : > { %v205_v0 = vld [vmem:[%s176_s5] sm:$0xff]  ;;  %v207_v1 = vld [vmem:[%s176_s5 + $0x10] sm:$0xff]  ;;  %v206_v2 = vld [vmem:[%s176_s5 + $0x8] sm:$0xff]  ;;  %s1071_s4 = scalar_lea.vmem [#allocation7], %s577_s28  ;;  %s605_s11 = sshll.u32 %s855_s16, 10 }
  0x48   : > { %786 = vsyncadd (%p1184_p3), [#allocation6], 4294967264  ;;  %v213_v3 = vunpack.c.l.bf16 %v205_v0  ;;  %v214_v4 = vunpack.c.h.bf16 %v205_v0  ;;  %v217_v5 = vunpack.c.l.bf16 %v207_v1  ;;  %v218_v6 = vunpack.c.h.bf16 %v207_v1  ;;  %v208_v7 = vld [vmem:[%s176_s5 + $0x18] sm:$0xff]  ;;  %v968_v8 = vld [vmem:[%s176_s5 + $0x20] sm:$0xff]  ;;  %s485_s20 = sshll.u32 %s1071_s4, 4  ;;  %s1119_s7 = scalar_lea.hbm %s1168_s3, %s605_s11  ;;  %s1121_s20 = int_to_ptr.vmem [resolvable:$true] %s485_s20 }
  0x49   : > { %v215_v9 = vunpack.c.l.bf16 %v206_v2  ;;  %v216_v10 = vunpack.c.h.bf16 %v206_v2  ;;  %v219_v11 = vunpack.c.l.bf16 %v208_v7  ;;  %v220_v12 = vunpack.c.h.bf16 %v208_v7  ;;  %v210_v13 = vld [vmem:[%s176_s5 + $0x28] sm:$0xff]  ;;  %v972_v22 = vld [vmem:[%s176_s5 + $0x30] sm:$0xff]  ;;  %v974_v23 = vld [vmem:[%s176_s5 + $0x38] sm:$0xff]  ;;  %s471_s16 = scalar_lea.sflag [#allocation4], %s954_s27  ;;  %s737_s30 = scalar_lea.vmem %s1121_s20, 1024 }
  0x4a   : > { %v229_v14 = vadd.f32 %v214_v4, %v213_v3  ;;  %v235_v15 = vadd.f32 %v218_v6, %v217_v5  ;;  %v221_v16 = vunpack.c.l.bf16 %v968_v8  ;;  %v222_v17 = vunpack.c.h.bf16 %v968_v8  ;;  %p738_p12 = scmp.ne.s32.totalorder %s1121_s20, %s737_s30  ;;  %p1185_p1 = scmp.ne.s32.totalorder %s1175_s24, 0 }
  0x4b   : > { %v232_v18 = vadd.f32 %v216_v10, %v215_v9  ;;  %v238_v19 = vadd.f32 %v220_v12, %v219_v11  ;;  %v223_v20 = vunpack.c.l.bf16 %v210_v13  ;;  %v224_v21 = vunpack.c.h.bf16 %v210_v13  ;;  %s811_s8 = smov [#allocation7]  }
  0x4c   : > { %230 = vadd.xlane.f32.xlu0 %v229_v14  ;;  %236 = vadd.xlane.f32.xlu1 %v235_v15  ;;  %v241_v24 = vadd.f32 %v222_v17, %v221_v16  ;;  %v225_v25 = vunpack.c.l.bf16 %v972_v22  ;;  %v226_v27 = vunpack.c.h.bf16 %v972_v22  ;;  %v227_v28 = vunpack.c.l.bf16 %v974_v23  ;;  %p739_p7 = pnand %p738_p12, %p1185_p1  ;;  %s741_s9 = sshll.u32 %s811_s8, 4  ;;  %s742_s9 = int_to_ptr.vmem [resolvable:$false] %s741_s9 }
  0x4d   : > { %v244_v26 = vadd.f32 %v224_v21, %v223_v20  ;;  %v228_v29 = vunpack.c.h.bf16 %v974_v23  ;;  %s743_s10 = scalar_lea.vmem %s742_s9, 2048  ;;  %p744_p9 = scmp.lt.s32.totalorder %s1121_s20, %s742_s9 }
  0x4e   : > { %v247_v30 = vadd.f32 %v226_v27, %v225_v25  ;;  %p740_p8 = pneg %p739_p7  ;;  %p745_p10 = scmp.lt.s32.totalorder %s743_s10, %s737_s30 }
  0x4f   : > { %v250_v31 = vadd.f32 %v228_v29, %v227_v28 }
  0x50   : > { %233 = vadd.xlane.f32.xlu0 %v232_v18  ;;  %239 = vadd.xlane.f32.xlu1 %v238_v19  ;;  %p746_p2 = por %p745_p10, %p744_p9 }
  0x52   : > { %p747_p0 = pnand %p746_p2, %p740_p8 }
  0x54   : > { %242 = vadd.xlane.f32.xlu0 %v241_v24  ;;  %245 = vadd.xlane.f32.xlu1 %v244_v26 }
  0x58   : > { %248 = vadd.xlane.f32.xlu0 %v247_v30  ;;  %251 = vadd.xlane.f32.xlu1 %v250_v31 }
  0xd5   : > { %v231_v32 = vpop.xlane.xlu0 %230  ;;  %v237_v33 = vpop.xlane.xlu1 %236 }
  0xd6   : > { %v254_v34 = vmul.f32 0.00390625, %v231_v32  ;;  %v256_v35 = vmul.f32 0.00390625, %v237_v33 }
  0xd8   : > { %v980_v36 = vsub.f32 %v213_v3, %v254_v34  ;;  %v982_v37 = vsub.f32 %v214_v4, %v254_v34  ;;  %v984_v38 = vsub.f32 %v217_v5, %v256_v35  ;;  %v986_v39 = vsub.f32 %v218_v6, %v256_v35 }
  0xd9   : > { %v234_v40 = vpop.xlane.xlu0 %233  ;;  %v240_v41 = vpop.xlane.xlu1 %239 }
  0xda   : > { %v255_v42 = vmul.f32 0.00390625, %v234_v40  ;;  %v257_v43 = vmul.f32 0.00390625, %v240_v41  ;;  %v278_v44 = vmul.f32 %v980_v36, %v980_v36  ;;  %v279_v45 = vmul.f32 %v982_v37, %v982_v37 }
  0xdb   : > { %v282_v46 = vmul.f32 %v984_v38, %v984_v38  ;;  %v283_v47 = vmul.f32 %v986_v39, %v986_v39 }
  0xdc   : > { %v996_v48 = vsub.f32 %v215_v9, %v255_v42  ;;  %v998_v49 = vsub.f32 %v216_v10, %v255_v42  ;;  %v1000_v50 = vsub.f32 %v219_v11, %v257_v43  ;;  %v1002_v51 = vsub.f32 %v220_v12, %v257_v43 }
  0xdd   : > { %v243_v52 = vpop.xlane.xlu0 %242  ;;  %v294_v53 = vadd.f32 %v279_v45, %v278_v44  ;;  %v246_v54 = vpop.xlane.xlu1 %245  ;;  %v300_v59 = vadd.f32 %v283_v47, %v282_v46 }
  0xde   : > { %v258_v55 = vmul.f32 0.00390625, %v243_v52  ;;  %v259_v56 = vmul.f32 0.00390625, %v246_v54  ;;  %v280_v57 = vmul.f32 %v996_v48, %v996_v48  ;;  %v281_v58 = vmul.f32 %v998_v49, %v998_v49 }
  0xdf   : > { %295 = vadd.xlane.f32.xlu0 %v294_v53  ;;  %v284_v60 = vmul.f32 %v1000_v50, %v1000_v50  ;;  %v285_v61 = vmul.f32 %v1002_v51, %v1002_v51 }
  0xe0   : > { %v1012_v62 = vsub.f32 %v221_v16, %v258_v55  ;;  %v1014_v63 = vsub.f32 %v222_v17, %v258_v55  ;;  %v1016_v0 = vsub.f32 %v223_v20, %v259_v56  ;;  %v1018_v1 = vsub.f32 %v224_v21, %v259_v56  ;;  %v358_v55 = vld [vmem:[#allocation5] sm:$0x3] }
  0xe1   : > { %v249_v2 = vpop.xlane.xlu0 %248  ;;  %v297_v3 = vadd.f32 %v281_v58, %v280_v57  ;;  %v252_v4 = vpop.xlane.xlu1 %251  ;;  %v303_v9 = vadd.f32 %v285_v61, %v284_v60  ;;  %v386_v56 = vld [vmem:[%s1167_s2] sm:$0x3] }
  0xe2   : > { %v260_v5 = vmul.f32 0.00390625, %v249_v2  ;;  %v261_v6 = vmul.f32 0.00390625, %v252_v4  ;;  %v286_v7 = vmul.f32 %v1012_v62, %v1012_v62  ;;  %v287_v8 = vmul.f32 %v1014_v63, %v1014_v63 }
  0xe3   : > { %301 = vadd.xlane.f32.xlu0 %v300_v59  ;;  %298 = vadd.xlane.f32.xlu1 %v297_v3  ;;  %v288_v10 = vmul.f32 %v1016_v0, %v1016_v0  ;;  %v289_v11 = vmul.f32 %v1018_v1, %v1018_v1 }
  0xe4   : > { %v1028_v12 = vsub.f32 %v225_v25, %v260_v5  ;;  %v1030_v13 = vsub.f32 %v226_v27, %v260_v5  ;;  %v1032_v14 = vsub.f32 %v227_v28, %v261_v6  ;;  %v1034_v15 = vsub.f32 %v228_v29, %v261_v6 }
  0xe5   : > { %v306_v16 = vadd.f32 %v287_v8, %v286_v7  ;;  %v309_v19 = vadd.f32 %v289_v11, %v288_v10  ;;  %v360_v27 = vlaneseq }
  0xe6   : > { %v290_v17 = vmul.f32 %v1028_v12, %v1028_v12  ;;  %v291_v18 = vmul.f32 %v1030_v13, %v1030_v13  ;;  %v292_v20 = vmul.f32 %v1032_v14, %v1032_v14  ;;  %v293_v21 = vmul.f32 %v1034_v15, %v1034_v15 }
  0xe7   : > { %304 = vadd.xlane.f32.xlu1 %v303_v9  ;;  %307 = vadd.xlane.f32.xlu0 %v306_v16  ;;  %v361_v34 = vshrl.u32 %v360_v27, 7 }
  0xe8   : > { %v312_v22 = vadd.f32 %v291_v18, %v290_v17  ;;  %v315_v23 = vadd.f32 %v293_v21, %v292_v20 }
  0xe9   : > { %v362_v45 = vsub.s32 0, %v361_v34  ;;  %v366_v52 = vsub.s32 1, %v361_v34 }
  0xeb   : > { %310 = vadd.xlane.f32.xlu1 %v309_v19  ;;  %313 = vadd.xlane.f32.xlu0 %v312_v22  ;;  %v1047_v60 = vrot.slane %v358_v55, %v362_v45  ;;  %v1049_v61 = vrot.slane %v358_v55, %v366_v52  ;;  %v1051_v4 = vrot.slane %v386_v56, %v362_v45 }
  0xec   : > { %v1053_v5 = vrot.slane %v386_v56, %v366_v52 }
  0xef   : > { %316 = vadd.xlane.f32.xlu1 %v315_v23 }
 0x168   : > { %v296_v24 = vpop.xlane.xlu0 %295 }
 0x169   : > { %v318_v25 = vmul.f32 0.00390625, %v296_v24 }
 0x16b   : > { %v326_v26 = vadd.f32 1e-05, %v318_v25 }
 0x16c   : > { %v299_v28 = vpop.xlane.xlu1 %298  ;;  %v302_v29 = vpop.xlane.xlu0 %301 }
 0x16d   : > { %667 = vrsqrt.f32 %v326_v26  ;;  %v319_v30 = vmul.f32 0.00390625, %v299_v28  ;;  %v320_v31 = vmul.f32 0.00390625, %v302_v29 }
 0x16f   : > { %v327_v32 = vadd.f32 1e-05, %v319_v30  ;;  %v328_v33 = vadd.f32 1e-05, %v320_v31 }
 0x170   : > { %v305_v35 = vpop.xlane.xlu1 %304  ;;  %v308_v40 = vpop.xlane.xlu0 %307 }
 0x171   : > { %669 = vrsqrt.f32 %v327_v32  ;;  %v321_v41 = vmul.f32 0.00390625, %v305_v35  ;;  %v322_v42 = vmul.f32 0.00390625, %v308_v40 }
 0x172   : > { %671 = vrsqrt.f32 %v328_v33 }
 0x173   : > { %v329_v43 = vadd.f32 1e-05, %v321_v41  ;;  %v330_v44 = vadd.f32 1e-05, %v322_v42 }
 0x174   : > { %v311_v46 = vpop.xlane.xlu1 %310  ;;  %v314_v47 = vpop.xlane.xlu0 %313 }
 0x175   : > { %673 = vrsqrt.f32 %v329_v43  ;;  %v323_v53 = vmul.f32 0.00390625, %v311_v46  ;;  %v324_v54 = vmul.f32 0.00390625, %v314_v47 }
 0x176   : > { %675 = vrsqrt.f32 %v330_v44 }
 0x177   : > { %v331_v57 = vadd.f32 1e-05, %v323_v53  ;;  %v332_v58 = vadd.f32 1e-05, %v324_v54 }
 0x178   : > { %v317_v59 = vpop.xlane.xlu1 %316 }
 0x179   : > { %677 = vrsqrt.f32 %v331_v57  ;;  %v325_v2 = vmul.f32 0.00390625, %v317_v59 }
 0x17a   : > { %v668_v3 = vpop.eup %667  ;;  %679 = vrsqrt.f32 %v332_v58 }
 0x17b   : > { %v342_v6 = vmul.f32 %v668_v3, %v980_v36  ;;  %v343_v7 = vmul.f32 %v668_v3, %v982_v37  ;;  %v333_v8 = vadd.f32 1e-05, %v325_v2 }
 0x17d   : > { %v370_v9 = vmul.f32 %v1047_v60, %v342_v6  ;;  %v371_v10 = vmul.f32 %v1049_v61, %v343_v7  ;;  %681 = vrsqrt.f32 %v333_v8 }
 0x17e   : > { %v670_v11 = vpop.eup %669 }
 0x17f   : > { %v672_v16 = vpop.eup %671  ;;  %v398_v17 = vadd.f32 %v1051_v4, %v370_v9  ;;  %v399_v18 = vadd.f32 %v1053_v5, %v371_v10  ;;  %v344_v19 = vmul.f32 %v670_v11, %v996_v48  ;;  %v345_v20 = vmul.f32 %v670_v11, %v998_v49 }
 0x180   : > { %v346_v36 = vmul.f32 %v672_v16, %v984_v38  ;;  %v347_v37 = vmul.f32 %v672_v16, %v986_v39 }
 0x181   : > { %v596_v21 = vpack.c.bf16 %v399_v18, %v398_v17  ;;  %v372_v22 = vmul.f32 %v1047_v60, %v344_v19  ;;  %v373_v23 = vmul.f32 %v1049_v61, %v345_v20 }
 0x182   : > { %v674_v24 = vpop.eup %673  ;;  %v374_v25 = vmul.f32 %v1047_v60, %v346_v36  ;;  %v375_v26 = vmul.f32 %v1049_v61, %v347_v37 }
 0x183   : > { %v676_v27 = vpop.eup %675  ;;  %462 = vst [vmem:[%s1071_s4] sm:$0xff] %v596_v21  ;;  %v400_v38 = vadd.f32 %v1051_v4, %v372_v22  ;;  %v401_v39 = vadd.f32 %v1053_v5, %v373_v23  ;;  %v348_v48 = vmul.f32 %v674_v24, %v1000_v50  ;;  %v349_v49 = vmul.f32 %v674_v24, %v1002_v51 }
 0x184   : > { %v402_v28 = vadd.f32 %v1051_v4, %v374_v25  ;;  %v403_v29 = vadd.f32 %v1053_v5, %v375_v26  ;;  %v350_v30 = vmul.f32 %v676_v27, %v1012_v62  ;;  %v351_v31 = vmul.f32 %v676_v27, %v1014_v63 }
 0x185   : > { %v597_v32 = vpack.c.bf16 %v401_v39, %v400_v38  ;;  %v376_v33 = vmul.f32 %v1047_v60, %v348_v48  ;;  %v377_v34 = vmul.f32 %v1049_v61, %v349_v49 }
 0x186   : > { %v678_v35 = vpop.eup %677  ;;  %v598_v40 = vpack.c.bf16 %v403_v29, %v402_v28  ;;  %v378_v50 = vmul.f32 %v1047_v60, %v350_v30  ;;  %v379_v51 = vmul.f32 %v1049_v61, %v351_v31 }
 0x187   : > { %v680_v41 = vpop.eup %679  ;;  %463 = vst [vmem:[%s1071_s4 + $0x8] sm:$0xff] %v597_v32  ;;  %v404_v42 = vadd.f32 %v1051_v4, %v376_v33  ;;  %v405_v62 = vadd.f32 %v1053_v5, %v377_v34  ;;  %v352_v63 = vmul.f32 %v678_v35, %v1016_v0  ;;  %v353_v43 = vmul.f32 %v678_v35, %v1018_v1 }
 0x188   : > { %464 = vst [vmem:[%s1071_s4 + $0x10] sm:$0xff] %v598_v40  ;;  %v406_v44 = vadd.f32 %v1051_v4, %v378_v50  ;;  %v407_v45 = vadd.f32 %v1053_v5, %v379_v51  ;;  %v354_v46 = vmul.f32 %v680_v41, %v1028_v12  ;;  %v355_v47 = vmul.f32 %v680_v41, %v1030_v13 }
 0x189   : > { %v599_v52 = vpack.c.bf16 %v405_v62, %v404_v42  ;;  %v380_v53 = vmul.f32 %v1047_v60, %v352_v63  ;;  %v381_v54 = vmul.f32 %v1049_v61, %v353_v43 }
 0x18a   : > { %v682_v55 = vpop.eup %681  ;;  %v600_v0 = vpack.c.bf16 %v407_v45, %v406_v44  ;;  %v382_v1 = vmul.f32 %v1047_v60, %v354_v46  ;;  %v383_v56 = vmul.f32 %v1049_v61, %v355_v47 }
 0x18b   : > { %465 = vst [vmem:[%s1071_s4 + $0x18] sm:$0xff] %v599_v52  ;;  %v408_v57 = vadd.f32 %v1051_v4, %v380_v53  ;;  %v409_v12 = vadd.f32 %v1053_v5, %v381_v54  ;;  %v356_v13 = vmul.f32 %v682_v55, %v1032_v14  ;;  %v357_v58 = vmul.f32 %v682_v55, %v1034_v15 }
 0x18c   : > { %466 = vst [vmem:[%s1071_s4 + $0x20] sm:$0xff] %v600_v0  ;;  %v410_v59 = vadd.f32 %v1051_v4, %v382_v1  ;;  %v411_v2 = vadd.f32 %v1053_v5, %v383_v56 }
 0x18d   : > { %v601_v3 = vpack.c.bf16 %v409_v12, %v408_v57  ;;  %v384_v6 = vmul.f32 %v1047_v60, %v356_v13  ;;  %v385_v7 = vmul.f32 %v1049_v61, %v357_v58 }
 0x18e   : > { %v602_v8 = vpack.c.bf16 %v411_v2, %v410_v59 }
 0x18f   : > { %467 = vst [vmem:[%s1071_s4 + $0x28] sm:$0xff] %v601_v3  ;;  %v412_v14 = vadd.f32 %v1051_v4, %v384_v6  ;;  %v413_v15 = vadd.f32 %v1053_v5, %v385_v7 }
 0x190   : > { %468 = vst [vmem:[%s1071_s4 + $0x30] sm:$0xff] %v602_v8 }
 0x191   : > { %v603_v60 = vpack.c.bf16 %v413_v15, %v412_v14 }
 0x193   : > { %469 = vst [vmem:[%s1071_s4 + $0x38] sm:$0xff] %v603_v60 }
 0x194   : > { %750 = shalt.err (!%p747_p0)
}
 0x195   : > { %s751_s17 = scalar_lea.hbm %s1119_s7, 1024  ;;  %s755_s29 = scalar_lea.hbm %s1168_s3, 2048 }
 0x196   : > { %p752_p4 = scmp.ne.s32.totalorder %s1119_s7, %s751_s17  ;;  %p756_p6 = scmp.lt.s32.totalorder %s1119_s7, %s1168_s3 }
 0x197   : > { %p757_p13 = scmp.lt.s32.totalorder %s755_s29, %s751_s17 }
 0x198   : > { %p753_p11 = pnand %p752_p4, %p1185_p1 }
 0x199   : > { %p758_p3 = por %p757_p13, %p756_p6 }
 0x19a   : > { %p754_p5 = pneg %p753_p11 }
 0x19c   : > { %p759_p12 = pnand %p758_p3, %p754_p5 }
 0x19e   : > { %762 = shalt.err (!%p759_p12)
}
 0x19f   : > { %s812_s26 = smov 128   ;;  %s813_s4 = smov 8  }
 0x1a0   : > { %612 = dma.vmem_to_hbm [thread:$0]  (%p1185_p1), %s1121_s20, 1024, %s1119_s7, %s471_s16, %s812_s26, %s812_s26, %s813_s4  }
 0x1a1 PF: > { %s500_s11 = sand.u32 1, %s793_s12   ;;  %p1186_p7 = scmp.ne.s32.totalorder %s1176_s25, 0 }
 0x1a2   : > { %p1187_p8 = scmp.ge.s32.totalorder %s805_s15, 2  ;;  %s501_s22 = scalar_lea.sflag [#allocation4], %s500_s11 }
 0x1a4   : > { %p623_p9 = pnand %p1187_p8, %p1186_p7 }
 0x1a6   : > { %p624_p10 = pneg %p623_p9 }
 0x1a8   : > { %788 = dma.done.wait (%p624_p10), %s501_s22, 1024  }
 0x1a9   : > { %790 = vsyncadd (%p624_p10), %s501_s22, 4294966272  ;;  %p17_p2 = scmp.ge.s32.totalorder %s859_s18, 4   ;;  %s1188_s12 = smov %s797_s13 }
 0x1aa   : > { %s1189_s13 = smov %s801_s14  ;;  %s1190_s14 = smov %s871_s21 }
 0x1ab   : > { %s1191_s15 = smov %s859_s18  ;;  %19 = sbr.rel (!%p17_p2) target bundleno = 6 (0x6), region = 81 }
 0x1b0   :  { %506 = vsyncpa [#allocation3], 1 }
 0x1b1   :  { %508 = vsyncpa [#allocation3 + $0x1], 1 }
 0x1b2   :  { %509 = vsyncpa [#allocation6], 1 }
 0x1b3   :  { %510 = vsyncpa [#allocation4], 1 }
 0x1b4   :  { %512 = vsyncpa [#allocation4 + $0x1], 1 }

</bundles_post_ra>
